<compile_context>
chip_gen: v5e
topology: v5e:2x2
jax: 0.10.0
libtpu: 0.0.40
codegen_flags: <defaults>
</compile_context>

<pallas_src>
import jax
import jax.numpy as jnp
from jax import lax
from jax.experimental import pallas as pl
from jax.experimental.pallas import tpu as pltpu

EPS = 1e-5
NEG_BIG = -1e30                     # pad value for unused logit lanes
PREC = jax.lax.Precision.HIGHEST    # used only by the plain-JAX reference


def _make_kernel(B, S, H):
    """Kernel body with all sizes baked in statically."""
    H1 = H - 4          # after conv1 (kernel (5,1))
    P1 = H1 // 2        # after maxpool (2,1)
    H2 = P1 - 4         # after conv2
    P2 = H2 // 2        # after maxpool (2,1); conv3 kernel height == P2
    N = B * S           # batch-like rows per H position

    def bn(a, g_ref, b_ref):
        # BatchNorm2d (train mode): per-channel stats over all rows
        # (= batch*H*W), biased variance, eps = 1e-5.
        inv_cnt = 1.0 / a.shape[0]
        mean = jnp.sum(a, axis=0, keepdims=True) * inv_cnt
        d = a - mean
        var = jnp.sum(d * d, axis=0, keepdims=True) * inv_cnt
        return d * (lax.rsqrt(var + EPS) * g_ref[...]) + b_ref[...]

    def maxpool2(a, Hin):
        # MaxPool2d((2,1)) along H.  Rows are H-major, so the two pool
        # inputs are the two aligned N-row halves of each 2N-row group:
        # a single VPU max, no concatenates.  Trailing odd row dropped
        # (torch floor semantics).
        Hp = Hin // 2
        C = a.shape[1]
        r = a[: Hp * 2 * N, :].reshape(Hp, 2 * N, C)
        m = jnp.maximum(r[:, :N, :], r[:, N:, :])
        return m.reshape(Hp * N, C)

    def im2col(a, taps, rows):
        # Lane-concatenate `taps` sublane-shifted (aligned, offsets k*N)
        # views of `a` -> (rows, taps*C) im2col LHS for one fused matmul.
        return jnp.concatenate(
            [a[k * N:k * N + rows, :] for k in range(taps)], axis=1)

    def kernel(xt_ref,
               w1_ref, b1_ref, g1_ref, be1_ref,
               w2_ref, b2_ref, g2_ref, be2_ref,
               w3_ref, b3_ref, g3_ref, be3_ref,
               wl_ref, bl_ref,
               out_ref):
        # ---- ConvBlock 1: Conv2d(1, C1, (5,1)) -> ReLU -> MaxPool(2,1) -> BN
        # im2col (H1*N, 5) was built in the wrapper; one K=5 matmul.
        a1 = jnp.dot(xt_ref[...], w1_ref[...],
                     preferred_element_type=jnp.float32) + b1_ref[...]
        a1 = jnp.maximum(a1, 0.0)
        p1 = bn(maxpool2(a1, H1), g1_ref, be1_ref)           # (P1*N, C1)

        # ---- ConvBlock 2: single (H2*N, 5*C1) @ (5*C1, C2) matmul
        lhs2 = im2col(p1, 5, H2 * N)
        a2 = jnp.dot(lhs2, w2_ref[...],
                     preferred_element_type=jnp.float32) + b2_ref[...]
        a2 = jnp.maximum(a2, 0.0)
        p2 = bn(maxpool2(a2, H2), g2_ref, be2_ref)           # (P2*N, C2)

        # ---- conv3 (full-height kernel, output height 1):
        # single (N, P2*C2) @ (P2*C2, C3) matmul.
        lhs3 = im2col(p2, P2, N)
        a3 = jnp.dot(lhs3, w3_ref[...],
                     preferred_element_type=jnp.float32) + b3_ref[...]
        a3 = jnp.maximum(a3, 0.0)
        a3 = bn(a3, g3_ref, be3_ref)                         # (N, C3), n = s*B + b

        # ---- label head: regroup to (B, S*C3), one matmul, softmax over a
        # 128-wide padded lane dim (padded logits are -1e30 -> exp == 0),
        # exact normalization, single unmasked lane-dense store.
        feat = jnp.concatenate([a3[s * B:(s + 1) * B, :] for s in range(S)],
                               axis=1)                       # (B, S*C3)
        logits = jnp.dot(feat, wl_ref[...],
                         preferred_element_type=jnp.float32) + bl_ref[...]
        m = jnp.max(logits, axis=1, keepdims=True)
        e = jnp.exp(logits - m)
        denom = jnp.sum(e, axis=1, keepdims=True)
        out_ref[...] = e / denom

    return kernel


def init_params(key, sensor_channels, window_size, labels,
                C1=50, C2=40, C3=20):
    K3 = ((window_size - 4) // 2 - 4) // 2
    ks = jax.random.split(key, 14)
    n = jax.random.normal
    return {
        # conv weights stored as (kH, Cin, Cout); torch Conv2d weight
        # W_pt[o, ci, kh, 0] == w[kh, ci, o]
        'w1': 0.3 * n(ks[0], (5, 1, C1), jnp.float32),
        'b1': 0.1 * n(ks[1], (C1,), jnp.float32),
        'g1': 1.0 + 0.1 * n(ks[2], (C1,), jnp.float32),
        'be1': 0.1 * n(ks[3], (C1,), jnp.float32),
        'w2': 0.1 * n(ks[4], (5, C1, C2), jnp.float32),
        'b2': 0.1 * n(ks[5], (C2,), jnp.float32),
        'g2': 1.0 + 0.1 * n(ks[6], (C2,), jnp.float32),
        'be2': 0.1 * n(ks[7], (C2,), jnp.float32),
        'w3': 0.1 * n(ks[8], (K3, C2, C3), jnp.float32),
        'b3': 0.1 * n(ks[9], (C3,), jnp.float32),
        'g3': 1.0 + 0.1 * n(ks[10], (C3,), jnp.float32),
        'be3': 0.1 * n(ks[11], (C3,), jnp.float32),
        # label linear in the torch layout: (L, C3 * sensor_channels)
        'wl': 0.1 * n(ks[12], (labels, C3 * sensor_channels), jnp.float32),
        'bl': 0.1 * n(ks[13], (labels,), jnp.float32),
    }


@jax.jit
def pmccnn_forward(x, params):
    """x: (B, sensor_channels, window_size), float32 (same as the torch module)."""
    B, S, H = x.shape
    C1 = params['w1'].shape[2]
    C2 = params['w2'].shape[2]
    C3 = params['w3'].shape[2]
    K3 = params['w3'].shape[0]
    L = params['bl'].shape[0]
    N = B * S
    H1 = H - 4
    Lp = ((L + 127) // 128) * 128        # lane-dense output width

    # ---- wrapper-side layout plumbing (pure XLA data movement) ----
    # rows H-major, n = s*B + b; conv1 im2col built here so the kernel input
    # is lane-dense(r) and the kernel never lane-broadcasts the raw signal.
    x_hm = jnp.transpose(x, (2, 1, 0)).reshape(H, N)                    # (H, N)
    x_taps = jnp.stack([x_hm[k:k + H1] for k in range(5)],
                       axis=-1).reshape(H1 * N, 5)                      # (H1*N, 5)

    w1k = params['w1'][:, 0, :]                                         # (5, C1)
    w2k = params['w2'].reshape(5 * C1, C2)                              # kh-major, ci-minor
    w3k = params['w3'].reshape(K3 * C2, C3)                             # h-major, ci-minor
    # label weight: kernel feat lane index is s*C3 + c; torch flat index is c*S + s
    wlk = jnp.transpose(params['wl'].reshape(L, C3, S), (2, 1, 0)).reshape(S * C3, L)
    wl_pad = jnp.zeros((S * C3, Lp), jnp.float32).at[:, :L].set(wlk)
    bl_pad = jnp.full((1, Lp), NEG_BIG, jnp.float32).at[0, :L].set(params['bl'])

    def row(v):
        return v[None, :]

    args = (x_taps,
            w1k, row(params['b1']), row(params['g1']), row(params['be1']),
            w2k, row(params['b2']), row(params['g2']), row(params['be2']),
            w3k, row(params['b3']), row(params['g3']), row(params['be3']),
            wl_pad, bl_pad)

    kernel = _make_kernel(B, S, H)
    vmem = pl.BlockSpec(memory_space=pltpu.MemorySpace.VMEM)
    # Gridless single-core call: the whole net is a few hundred KB of VMEM
    # at these sizes.  (See module-level TODO for the batched/grid version.)
    out = pl.pallas_call(
        kernel,
        out_shape=jax.ShapeDtypeStruct((B, Lp), jnp.float32),
        in_specs=[vmem] * len(args),
        out_specs=vmem,
    )(*args)
    return out[:, :L]


def reference_forward(x, p):
    """Plain-JAX mirror of the PyTorch forward (NCHW), for verification."""
    B, S, W = x.shape
    h = jnp.transpose(x, (0, 2, 1))[:, None, :, :]                # (B,1,W,S) NCHW

    def conv_h(inp, w, b):
        K = w.shape[0]
        Hout = inp.shape[2] - K + 1
        out = b[None, :, None, None]
        for kh in range(K):
            out = out + jnp.einsum('bchs,co->bohs', inp[:, :, kh:kh + Hout, :],
                                   w[kh], precision=PREC)
        return out

    def bn(a, g, be):
        mean = jnp.mean(a, axis=(0, 2, 3), keepdims=True)
        var = jnp.mean((a - mean) ** 2, axis=(0, 2, 3), keepdims=True)
        return ((a - mean) / jnp.sqrt(var + EPS)
                * g[None, :, None, None] + be[None, :, None, None])

    def pool(a):
        Hc = a.shape[2]
        return jnp.maximum(a[:, :, 0:(Hc // 2) * 2:2, :],
                           a[:, :, 1:(Hc // 2) * 2:2, :])

    a = jax.nn.relu(conv_h(h, p['w1'], p['b1']))
    a = bn(pool(a), p['g1'], p['be1'])
    a = jax.nn.relu(conv_h(a, p['w2'], p['b2']))
    a = bn(pool(a), p['g2'], p['be2'])
    a = jax.nn.relu(conv_h(a, p['w3'], p['b3']))                  # (B,C3,1,S)
    a = bn(a, p['g3'], p['be3'])
    feat = a.reshape(B, -1)
    y = jnp.einsum('bk,lk->bl', feat, p['wl'], precision=PREC) + p['bl']
    return jax.nn.softmax(y, axis=1)


if __name__ == "__main__":
    # pMCCNN(window_size=28, channels=4, labels=6, domains=3); x: (B, channels, window)
    # Note B * channels = 8, so all kernel sublane slices are 8-row aligned.
    B, SENSORS, WINDOW, LABELS = 2, 4, 28, 6
    key = jax.random.PRNGKey(0)
    kx, kp = jax.random.split(key)
    x = jax.random.normal(kx, (B, SENSORS, WINDOW), jnp.float32)
    params = init_params(kp, SENSORS, WINDOW, LABELS)

    out = pmccnn_forward(x, params)
    out = jax.block_until_ready(out)
    assert out.shape == (B, LABELS)

    # softmax rows must sum to 1 (exact divide, no approx reciprocal)
    row_sum_err = float(jnp.max(jnp.abs(jnp.sum(out, axis=1) - 1.0)))
    if not row_sum_err < 1e-5:
        raise AssertionError(f"softmax rows do not sum to 1: err {row_sum_err}")

    ref = jax.block_until_ready(reference_forward(x, params))
    err = float(jnp.max(jnp.abs(out - ref)))
    # Kernel matmuls run at default MXU precision (bf16 operand passes); the
    # reference uses f32 HIGHEST, so allow bf16-level slack on the softmax
    # outputs.  (Not MXU-bound here; precision could be raised if needed.)
    if not err < 2e-2:
        raise AssertionError(f"Pallas kernel mismatch vs reference: max abs err {err}")

    print("KERNEL_OK")
</pallas_src>

<mosaic_0001>
module attributes {stable_mosaic.version = 11 : i64} {
  func.func @kernel(%arg0: memref<192x5xf32, #tpu.memory_space<vmem>>, %arg1: memref<5x50xf32, #tpu.memory_space<vmem>>, %arg2: memref<1x50xf32, #tpu.memory_space<vmem>>, %arg3: memref<1x50xf32, #tpu.memory_space<vmem>>, %arg4: memref<1x50xf32, #tpu.memory_space<vmem>>, %arg5: memref<250x40xf32, #tpu.memory_space<vmem>>, %arg6: memref<1x40xf32, #tpu.memory_space<vmem>>, %arg7: memref<1x40xf32, #tpu.memory_space<vmem>>, %arg8: memref<1x40xf32, #tpu.memory_space<vmem>>, %arg9: memref<160x20xf32, #tpu.memory_space<vmem>>, %arg10: memref<1x20xf32, #tpu.memory_space<vmem>>, %arg11: memref<1x20xf32, #tpu.memory_space<vmem>>, %arg12: memref<1x20xf32, #tpu.memory_space<vmem>>, %arg13: memref<80x128xf32, #tpu.memory_space<vmem>>, %arg14: memref<1x128xf32, #tpu.memory_space<vmem>>, %arg15: memref<2x128xf32, #tpu.memory_space<vmem>>) attributes {dimension_semantics = [], scalar_prefetch = 0 : i64, scratch_operands = 0 : i64, tpu.core_type = #tpu.core_type<tc>} {
    %c0 = arith.constant 0 : index
    %c0_0 = arith.constant 0 : index
    %0 = vector.load %arg0[%c0, %c0_0] : memref<192x5xf32, #tpu.memory_space<vmem>>, vector<192x5xf32>
    %c0_1 = arith.constant 0 : index
    %c0_2 = arith.constant 0 : index
    %1 = vector.load %arg1[%c0_1, %c0_2] : memref<5x50xf32, #tpu.memory_space<vmem>>, vector<5x50xf32>
    %cst = arith.constant dense<0.000000e+00> : vector<192x50xf32>
    %2 = tpu.matmul %0, %1, %cst {dimension_numbers = #tpu.dot_dimension_numbers<[1], [0], [0], [1], [0, 0, 1, 1], [], []>} : vector<192x5xf32>, vector<5x50xf32>, vector<192x50xf32> -> vector<192x50xf32>
    %c0_3 = arith.constant 0 : index
    %c0_4 = arith.constant 0 : index
    %3 = vector.load %arg2[%c0_3, %c0_4] : memref<1x50xf32, #tpu.memory_space<vmem>>, vector<1x50xf32>
    %4 = vector.broadcast %3 : vector<1x50xf32> to vector<192x50xf32>
    %5 = arith.addf %2, %4 : vector<192x50xf32>
    %cst_5 = arith.constant 0.000000e+00 : f32
    %6 = vector.broadcast %cst_5 : f32 to vector<192x50xf32>
    %7 = arith.maximumf %5, %6 : vector<192x50xf32>
    %8 = vector.shape_cast %7 : vector<192x50xf32> to vector<12x16x50xf32>
    %9 = vector.extract_strided_slice %8 {offsets = [0, 0, 0], sizes = [12, 8, 50], strides = [1, 1, 1]} : vector<12x16x50xf32> to vector<12x8x50xf32>
    %10 = vector.extract_strided_slice %8 {offsets = [0, 8, 0], sizes = [12, 8, 50], strides = [1, 1, 1]} : vector<12x16x50xf32> to vector<12x8x50xf32>
    %11 = arith.maximumf %9, %10 : vector<12x8x50xf32>
    %12 = vector.shape_cast %11 : vector<12x8x50xf32> to vector<96x50xf32>
    %cst_6 = arith.constant dense<0.000000e+00> : vector<50xf32>
    %13 = vector.multi_reduction <add>, %12, %cst_6 [0] : vector<96x50xf32> to vector<50xf32>
    %14 = vector.shape_cast %13 : vector<50xf32> to vector<1x50xf32>
    %cst_7 = arith.constant 0.010416667 : f32
    %15 = vector.broadcast %cst_7 : f32 to vector<1x50xf32>
    %16 = arith.mulf %14, %15 : vector<1x50xf32>
    %17 = vector.broadcast %16 : vector<1x50xf32> to vector<96x50xf32>
    %18 = arith.subf %12, %17 : vector<96x50xf32>
    %19 = arith.mulf %18, %18 : vector<96x50xf32>
    %cst_8 = arith.constant dense<0.000000e+00> : vector<50xf32>
    %20 = vector.multi_reduction <add>, %19, %cst_8 [0] : vector<96x50xf32> to vector<50xf32>
    %21 = vector.shape_cast %20 : vector<50xf32> to vector<1x50xf32>
    %cst_9 = arith.constant 0.010416667 : f32
    %22 = vector.broadcast %cst_9 : f32 to vector<1x50xf32>
    %23 = arith.mulf %21, %22 : vector<1x50xf32>
    %cst_10 = arith.constant 9.99999974E-6 : f32
    %24 = vector.broadcast %cst_10 : f32 to vector<1x50xf32>
    %25 = arith.addf %23, %24 : vector<1x50xf32>
    %26 = math.rsqrt %25 : vector<1x50xf32>
    %c0_11 = arith.constant 0 : index
    %c0_12 = arith.constant 0 : index
    %27 = vector.load %arg3[%c0_11, %c0_12] : memref<1x50xf32, #tpu.memory_space<vmem>>, vector<1x50xf32>
    %28 = arith.mulf %26, %27 : vector<1x50xf32>
    %29 = vector.broadcast %28 : vector<1x50xf32> to vector<96x50xf32>
    %30 = arith.mulf %18, %29 : vector<96x50xf32>
    %c0_13 = arith.constant 0 : index
    %c0_14 = arith.constant 0 : index
    %31 = vector.load %arg4[%c0_13, %c0_14] : memref<1x50xf32, #tpu.memory_space<vmem>>, vector<1x50xf32>
    %32 = vector.broadcast %31 : vector<1x50xf32> to vector<96x50xf32>
    %33 = arith.addf %30, %32 : vector<96x50xf32>
    %34 = vector.extract_strided_slice %33 {offsets = [0, 0], sizes = [64, 50], strides = [1, 1]} : vector<96x50xf32> to vector<64x50xf32>
    %35 = vector.extract_strided_slice %33 {offsets = [8, 0], sizes = [64, 50], strides = [1, 1]} : vector<96x50xf32> to vector<64x50xf32>
    %36 = vector.extract_strided_slice %33 {offsets = [16, 0], sizes = [64, 50], strides = [1, 1]} : vector<96x50xf32> to vector<64x50xf32>
    %37 = vector.extract_strided_slice %33 {offsets = [24, 0], sizes = [64, 50], strides = [1, 1]} : vector<96x50xf32> to vector<64x50xf32>
    %38 = vector.extract_strided_slice %33 {offsets = [32, 0], sizes = [64, 50], strides = [1, 1]} : vector<96x50xf32> to vector<64x50xf32>
    %39 = tpu.concatenate %34, %35, %36, %37, %38 in 1 : vector<64x50xf32>, vector<64x50xf32>, vector<64x50xf32>, vector<64x50xf32>, vector<64x50xf32> -> vector<64x250xf32>
    %c0_15 = arith.constant 0 : index
    %c0_16 = arith.constant 0 : index
    %40 = vector.load %arg5[%c0_15, %c0_16] : memref<250x40xf32, #tpu.memory_space<vmem>>, vector<250x40xf32>
    %cst_17 = arith.constant dense<0.000000e+00> : vector<64x40xf32>
    %41 = tpu.matmul %39, %40, %cst_17 {dimension_numbers = #tpu.dot_dimension_numbers<[1], [0], [0], [1], [0, 0, 1, 1], [], []>} : vector<64x250xf32>, vector<250x40xf32>, vector<64x40xf32> -> vector<64x40xf32>
    %c0_18 = arith.constant 0 : index
    %c0_19 = arith.constant 0 : index
    %42 = vector.load %arg6[%c0_18, %c0_19] : memref<1x40xf32, #tpu.memory_space<vmem>>, vector<1x40xf32>
    %43 = vector.broadcast %42 : vector<1x40xf32> to vector<64x40xf32>
    %44 = arith.addf %41, %43 : vector<64x40xf32>
    %cst_20 = arith.constant 0.000000e+00 : f32
    %45 = vector.broadcast %cst_20 : f32 to vector<64x40xf32>
    %46 = arith.maximumf %44, %45 : vector<64x40xf32>
    %47 = vector.shape_cast %46 : vector<64x40xf32> to vector<4x16x40xf32>
    %48 = vector.extract_strided_slice %47 {offsets = [0, 0, 0], sizes = [4, 8, 40], strides = [1, 1, 1]} : vector<4x16x40xf32> to vector<4x8x40xf32>
    %49 = vector.extract_strided_slice %47 {offsets = [0, 8, 0], sizes = [4, 8, 40], strides = [1, 1, 1]} : vector<4x16x40xf32> to vector<4x8x40xf32>
    %50 = arith.maximumf %48, %49 : vector<4x8x40xf32>
    %51 = vector.shape_cast %50 : vector<4x8x40xf32> to vector<32x40xf32>
    %cst_21 = arith.constant dense<0.000000e+00> : vector<40xf32>
    %52 = vector.multi_reduction <add>, %51, %cst_21 [0] : vector<32x40xf32> to vector<40xf32>
    %53 = vector.shape_cast %52 : vector<40xf32> to vector<1x40xf32>
    %cst_22 = arith.constant 3.125000e-02 : f32
    %54 = vector.broadcast %cst_22 : f32 to vector<1x40xf32>
    %55 = arith.mulf %53, %54 : vector<1x40xf32>
    %56 = vector.broadcast %55 : vector<1x40xf32> to vector<32x40xf32>
    %57 = arith.subf %51, %56 : vector<32x40xf32>
    %58 = arith.mulf %57, %57 : vector<32x40xf32>
    %cst_23 = arith.constant dense<0.000000e+00> : vector<40xf32>
    %59 = vector.multi_reduction <add>, %58, %cst_23 [0] : vector<32x40xf32> to vector<40xf32>
    %60 = vector.shape_cast %59 : vector<40xf32> to vector<1x40xf32>
    %cst_24 = arith.constant 3.125000e-02 : f32
    %61 = vector.broadcast %cst_24 : f32 to vector<1x40xf32>
    %62 = arith.mulf %60, %61 : vector<1x40xf32>
    %cst_25 = arith.constant 9.99999974E-6 : f32
    %63 = vector.broadcast %cst_25 : f32 to vector<1x40xf32>
    %64 = arith.addf %62, %63 : vector<1x40xf32>
    %65 = math.rsqrt %64 : vector<1x40xf32>
    %c0_26 = arith.constant 0 : index
    %c0_27 = arith.constant 0 : index
    %66 = vector.load %arg7[%c0_26, %c0_27] : memref<1x40xf32, #tpu.memory_space<vmem>>, vector<1x40xf32>
    %67 = arith.mulf %65, %66 : vector<1x40xf32>
    %68 = vector.broadcast %67 : vector<1x40xf32> to vector<32x40xf32>
    %69 = arith.mulf %57, %68 : vector<32x40xf32>
    %c0_28 = arith.constant 0 : index
    %c0_29 = arith.constant 0 : index
    %70 = vector.load %arg8[%c0_28, %c0_29] : memref<1x40xf32, #tpu.memory_space<vmem>>, vector<1x40xf32>
    %71 = vector.broadcast %70 : vector<1x40xf32> to vector<32x40xf32>
    %72 = arith.addf %69, %71 : vector<32x40xf32>
    %73 = vector.extract_strided_slice %72 {offsets = [0, 0], sizes = [8, 40], strides = [1, 1]} : vector<32x40xf32> to vector<8x40xf32>
    %74 = vector.extract_strided_slice %72 {offsets = [8, 0], sizes = [8, 40], strides = [1, 1]} : vector<32x40xf32> to vector<8x40xf32>
    %75 = vector.extract_strided_slice %72 {offsets = [16, 0], sizes = [8, 40], strides = [1, 1]} : vector<32x40xf32> to vector<8x40xf32>
    %76 = vector.extract_strided_slice %72 {offsets = [24, 0], sizes = [8, 40], strides = [1, 1]} : vector<32x40xf32> to vector<8x40xf32>
    %77 = tpu.concatenate %73, %74, %75, %76 in 1 : vector<8x40xf32>, vector<8x40xf32>, vector<8x40xf32>, vector<8x40xf32> -> vector<8x160xf32>
    %c0_30 = arith.constant 0 : index
    %c0_31 = arith.constant 0 : index
    %78 = vector.load %arg9[%c0_30, %c0_31] : memref<160x20xf32, #tpu.memory_space<vmem>>, vector<160x20xf32>
    %cst_32 = arith.constant dense<0.000000e+00> : vector<8x20xf32>
    %79 = tpu.matmul %77, %78, %cst_32 {dimension_numbers = #tpu.dot_dimension_numbers<[1], [0], [0], [1], [0, 0, 1, 1], [], []>} : vector<8x160xf32>, vector<160x20xf32>, vector<8x20xf32> -> vector<8x20xf32>
    %c0_33 = arith.constant 0 : index
    %c0_34 = arith.constant 0 : index
    %80 = vector.load %arg10[%c0_33, %c0_34] : memref<1x20xf32, #tpu.memory_space<vmem>>, vector<1x20xf32>
    %81 = vector.broadcast %80 : vector<1x20xf32> to vector<8x20xf32>
    %82 = arith.addf %79, %81 : vector<8x20xf32>
    %cst_35 = arith.constant 0.000000e+00 : f32
    %83 = vector.broadcast %cst_35 : f32 to vector<8x20xf32>
    %84 = arith.maximumf %82, %83 : vector<8x20xf32>
    %cst_36 = arith.constant dense<0.000000e+00> : vector<20xf32>
    %85 = vector.multi_reduction <add>, %84, %cst_36 [0] : vector<8x20xf32> to vector<20xf32>
    %86 = vector.shape_cast %85 : vector<20xf32> to vector<1x20xf32>
    %cst_37 = arith.constant 1.250000e-01 : f32
    %87 = vector.broadcast %cst_37 : f32 to vector<1x20xf32>
    %88 = arith.mulf %86, %87 : vector<1x20xf32>
    %89 = vector.broadcast %88 : vector<1x20xf32> to vector<8x20xf32>
    %90 = arith.subf %84, %89 : vector<8x20xf32>
    %91 = arith.mulf %90, %90 : vector<8x20xf32>
    %cst_38 = arith.constant dense<0.000000e+00> : vector<20xf32>
    %92 = vector.multi_reduction <add>, %91, %cst_38 [0] : vector<8x20xf32> to vector<20xf32>
    %93 = vector.shape_cast %92 : vector<20xf32> to vector<1x20xf32>
    %cst_39 = arith.constant 1.250000e-01 : f32
    %94 = vector.broadcast %cst_39 : f32 to vector<1x20xf32>
    %95 = arith.mulf %93, %94 : vector<1x20xf32>
    %cst_40 = arith.constant 9.99999974E-6 : f32
    %96 = vector.broadcast %cst_40 : f32 to vector<1x20xf32>
    %97 = arith.addf %95, %96 : vector<1x20xf32>
    %98 = math.rsqrt %97 : vector<1x20xf32>
    %c0_41 = arith.constant 0 : index
    %c0_42 = arith.constant 0 : index
    %99 = vector.load %arg11[%c0_41, %c0_42] : memref<1x20xf32, #tpu.memory_space<vmem>>, vector<1x20xf32>
    %100 = arith.mulf %98, %99 : vector<1x20xf32>
    %101 = vector.broadcast %100 : vector<1x20xf32> to vector<8x20xf32>
    %102 = arith.mulf %90, %101 : vector<8x20xf32>
    %c0_43 = arith.constant 0 : index
    %c0_44 = arith.constant 0 : index
    %103 = vector.load %arg12[%c0_43, %c0_44] : memref<1x20xf32, #tpu.memory_space<vmem>>, vector<1x20xf32>
    %104 = vector.broadcast %103 : vector<1x20xf32> to vector<8x20xf32>
    %105 = arith.addf %102, %104 : vector<8x20xf32>
    %106 = vector.extract_strided_slice %105 {offsets = [0, 0], sizes = [2, 20], strides = [1, 1]} : vector<8x20xf32> to vector<2x20xf32>
    %107 = vector.extract_strided_slice %105 {offsets = [2, 0], sizes = [2, 20], strides = [1, 1]} : vector<8x20xf32> to vector<2x20xf32>
    %108 = vector.extract_strided_slice %105 {offsets = [4, 0], sizes = [2, 20], strides = [1, 1]} : vector<8x20xf32> to vector<2x20xf32>
    %109 = vector.extract_strided_slice %105 {offsets = [6, 0], sizes = [2, 20], strides = [1, 1]} : vector<8x20xf32> to vector<2x20xf32>
    %110 = tpu.concatenate %106, %107, %108, %109 in 1 : vector<2x20xf32>, vector<2x20xf32>, vector<2x20xf32>, vector<2x20xf32> -> vector<2x80xf32>
    %c0_45 = arith.constant 0 : index
    %c0_46 = arith.constant 0 : index
    %111 = vector.load %arg13[%c0_45, %c0_46] : memref<80x128xf32, #tpu.memory_space<vmem>>, vector<80x128xf32>
    %cst_47 = arith.constant dense<0.000000e+00> : vector<2x128xf32>
    %112 = tpu.matmul %110, %111, %cst_47 {dimension_numbers = #tpu.dot_dimension_numbers<[1], [0], [0], [1], [0, 0, 1, 1], [], []>} : vector<2x80xf32>, vector<80x128xf32>, vector<2x128xf32> -> vector<2x128xf32>
    %c0_48 = arith.constant 0 : index
    %c0_49 = arith.constant 0 : index
    %113 = vector.load %arg14[%c0_48, %c0_49] : memref<1x128xf32, #tpu.memory_space<vmem>>, vector<1x128xf32>
    %114 = vector.broadcast %113 : vector<1x128xf32> to vector<2x128xf32>
    %115 = arith.addf %112, %114 : vector<2x128xf32>
    %cst_50 = arith.constant dense<0xFF800000> : vector<2xf32>
    %116 = vector.multi_reduction <maximumf>, %115, %cst_50 [1] : vector<2x128xf32> to vector<2xf32>
    %117 = vector.shape_cast %116 : vector<2xf32> to vector<2x1xf32>
    %118 = vector.broadcast %117 : vector<2x1xf32> to vector<2x128xf32>
    %119 = arith.subf %115, %118 : vector<2x128xf32>
    %120 = math.exp %119 : vector<2x128xf32>
    %cst_51 = arith.constant dense<0.000000e+00> : vector<2xf32>
    %121 = vector.multi_reduction <add>, %120, %cst_51 [1] : vector<2x128xf32> to vector<2xf32>
    %122 = vector.shape_cast %121 : vector<2xf32> to vector<2x1xf32>
    %123 = vector.broadcast %122 : vector<2x1xf32> to vector<2x128xf32>
    %124 = arith.divf %120, %123 : vector<2x128xf32>
    %c0_52 = arith.constant 0 : index
    %c0_53 = arith.constant 0 : index
    %125 = vector.load %arg15[%c0_52, %c0_53] : memref<2x128xf32, #tpu.memory_space<vmem>>, vector<2x128xf32>
    tpu.vector_store %arg15[%c0_52, %c0_53], %124 {strides = array<i32>} : memref<2x128xf32, #tpu.memory_space<vmem>>, vector<2x128xf32>,
    return
  }
}

</mosaic_0001>

<bundles_post_ra>
// kernel: pmccnn_forward.1
= control target key start
LH: loop header
LB: loop body
LE: loop exit
PB: predicated region body
PF: predicated region fallthrough
CT: control target
= control target key end

     0   :  { %vm153_vm0 = vcmask 1044480   ;;  %vm80_vm1 = vcmask 39936   ;;  %s1772_s0 = inlined_call_operand.vmem [shape: f32[192,5], index: 0, kind: input, shape index: {}]   ;;  %s1773_s1 = inlined_call_operand.vmem [shape: f32[5,50], index: 1, kind: input, shape index: {}]   ;;  %s1774_s2 = inlined_call_operand.vmem [shape: f32[1,50], index: 2, kind: input, shape index: {}]   ;;  %s1775_s3 = inlined_call_operand.vmem [shape: f32[1,50], index: 3, kind: input, shape index: {}]   ;;  %s1776_s4 = inlined_call_operand.vmem [shape: f32[1,50], index: 4, kind: input, shape index: {}]   ;;  %s1777_s5 = inlined_call_operand.vmem [shape: f32[250,40], index: 5, kind: input, shape index: {}]   ;;  %s1778_s6 = inlined_call_operand.vmem [shape: f32[1,40], index: 6, kind: input, shape index: {}]   ;;  %s1779_s7 = inlined_call_operand.vmem [shape: f32[1,40], index: 7, kind: input, shape index: {}]   ;;  %s1780_s8 = inlined_call_operand.vmem [shape: f32[1,40], index: 8, kind: input, shape index: {}]   ;;  %s1781_s9 = inlined_call_operand.vmem [shape: f32[160,20], index: 9, kind: input, shape index: {}]   ;;  %s1782_s10 = inlined_call_operand.vmem [shape: f32[1,20], index: 10, kind: input, shape index: {}]   ;;  %s1783_s11 = inlined_call_operand.vmem [shape: f32[1,20], index: 11, kind: input, shape index: {}]   ;;  %s1784_s12 = inlined_call_operand.vmem [shape: f32[1,20], index: 12, kind: input, shape index: {}]   ;;  %s1785_s13 = inlined_call_operand.vmem [shape: f32[80,128], index: 13, kind: input, shape index: {}]   ;;  %s1786_s14 = inlined_call_operand.vmem [shape: f32[1,128], index: 14, kind: input, shape index: {}]   ;;  %s1787_s15 = inlined_call_operand.hbm [shape: f32[2,128], index: 15, kind: output, shape index: {}]  }
   0x1   :  { %v75_v0 = vld [vmem:[%s1773_s1] sm:$0x1f]  ;;  %v64_v2 = vld [vmem:[%s1772_s0 + $0x68] sm:$0xff] }
   0x2   :  { %v51_v1 = vld [vmem:[%s1772_s0] sm:$0xff]  ;;  %992 = vmatpush.msk.msra.mxu0 %vm153_vm0, %v75_v0  ;;  %1028 = vmatpush.msk.msra.mxu3 %vm153_vm0, %v75_v0 }
   0x3   :  { %993 = vmatmul.msk.f32.vlgmr.msra.gmra.mxu0 %vm80_vm1, %v51_v1  ;;  %1006 = vmatmul.msk.f32.vlgmr.msra.gmra.mxu3 %vm80_vm1, %v64_v2 }
   0x4   :  { %20 = vsyncpa [#allocation3], 0  ;;  %v52_v3 = vld [vmem:[%s1772_s0 + $0x8] sm:$0xff]  ;;  %v65_v4 = vld [vmem:[%s1772_s0 + $0x70] sm:$0xff]  ;;  %vm282_vm2 = vcmask 408576   ;;  %s1099_s24 = smov 22  }
   0x5   :  { %v53_v5 = vld [vmem:[%s1772_s0 + $0x10] sm:$0xff]  ;;  %v66_v6 = vld [vmem:[%s1772_s0 + $0x78] sm:$0xff]  ;;  %v67_v8 = vld [vmem:[%s1772_s0 + $0x80] sm:$0xff]  ;;  %s1100_s25 = smov 50   ;;  %vm612_vm6 = vcmask 1041408   ;;  %vm542_vm7 = vcmask 588800  }
   0x6   :  { %v54_v7 = vld [vmem:[%s1772_s0 + $0x18] sm:$0xff]  ;;  %v55_v9 = vld [vmem:[%s1772_s0 + $0x20] sm:$0xff]  ;;  %v68_v10 = vld [vmem:[%s1772_s0 + $0x88] sm:$0xff]  ;;  %vm533_vm8 = vcmask 179200   ;;  %vm587_vm9 = vcmask 998400   ;;  %vm524_vm10 = vcmask 818176  }
   0x7   :  { %v56_v11 = vld [vmem:[%s1772_s0 + $0x28] sm:$0xff]  ;;  %v69_v12 = vld [vmem:[%s1772_s0 + $0x90] sm:$0xff]  ;;  %v70_v14 = vld [vmem:[%s1772_s0 + $0x98] sm:$0xff]  ;;  %vm710_vm11 = vcmask 326656   ;;  %vm786_vm15 = vcmask 654336   ;;  %vm788_vm0 = vcmask 982016  }
   0x8   :  { %v57_v13 = vld [vmem:[%s1772_s0 + $0x30] sm:$0xff]  ;;  %v58_v15 = vld [vmem:[%s1772_s0 + $0x38] sm:$0xff]  ;;  %v71_v16 = vld [vmem:[%s1772_s0 + $0xa0] sm:$0xff]  ;;  %s1104_s27 = smov 60   ;;  %s1105_s28 = smov 20  }
   0x9   :  { %v59_v17 = vld [vmem:[%s1772_s0 + $0x40] sm:$0xff]  ;;  %v72_v18 = vld [vmem:[%s1772_s0 + $0xa8] sm:$0xff]  ;;  %v73_v20 = vld [vmem:[%s1772_s0 + $0xb0] sm:$0xff]  ;;  %s983_s19 = sshll.u32 %s1787_s15, 4  ;;  %s984_s19 = int_to_ptr.hbm [resolvable:$true] %s983_s19 }
   0xa   :  { %v60_v19 = vld [vmem:[%s1772_s0 + $0x48] sm:$0xff]  ;;  %v61_v21 = vld [vmem:[%s1772_s0 + $0x50] sm:$0xff]  ;;  %v74_v22 = vld [vmem:[%s1772_s0 + $0xb8] sm:$0xff] }
   0xb   :  { %994 = vmatmul.msk.f32.gmra.mxu0 %vm80_vm1, %v52_v3  ;;  %1007 = vmatmul.msk.f32.gmra.mxu3 %vm80_vm1, %v65_v4  ;;  %v62_v23 = vld [vmem:[%s1772_s0 + $0x58] sm:$0xff]  ;;  %v63_v24 = vld [vmem:[%s1772_s0 + $0x60] sm:$0xff]  ;;  %s1103_s0 = smov 40  }
   0xc   :  { %v1289_v26 = vld [vmem:[%s1774_s2] ss:$0 sm:$0xff] }
  0x13   :  { %995 = vmatmul.msk.f32.gmra.mxu0 %vm80_vm1, %v53_v5  ;;  %1008 = vmatmul.msk.f32.gmra.mxu3 %vm80_vm1, %v66_v6 }
  0x1b   :  { %996 = vmatmul.msk.f32.gmra.mxu0 %vm80_vm1, %v54_v7  ;;  %1009 = vmatmul.msk.f32.gmra.mxu3 %vm80_vm1, %v67_v8 }
  0x23   :  { %997 = vmatmul.msk.f32.gmra.mxu0 %vm80_vm1, %v55_v9  ;;  %1010 = vmatmul.msk.f32.gmra.mxu3 %vm80_vm1, %v68_v10 }
  0x2b   :  { %998 = vmatmul.msk.f32.gmra.mxu0 %vm80_vm1, %v56_v11  ;;  %1011 = vmatmul.msk.f32.gmra.mxu3 %vm80_vm1, %v69_v12 }
  0x33   :  { %999 = vmatmul.msk.f32.gmra.mxu0 %vm80_vm1, %v57_v13  ;;  %1012 = vmatmul.msk.f32.gmra.mxu3 %vm80_vm1, %v70_v14 }
  0x3b   :  { %1000 = vmatmul.msk.f32.gmra.mxu0 %vm80_vm1, %v58_v15  ;;  %1013 = vmatmul.msk.f32.gmra.mxu3 %vm80_vm1, %v71_v16 }
  0x43   :  { %1001 = vmatmul.msk.f32.gmra.mxu0 %vm80_vm1, %v59_v17  ;;  %1014 = vmatmul.msk.f32.gmra.mxu3 %vm80_vm1, %v72_v18 }
  0x4b   :  { %1002 = vmatmul.msk.f32.gmra.mxu0 %vm80_vm1, %v60_v19  ;;  %1015 = vmatmul.msk.f32.gmra.mxu3 %vm80_vm1, %v73_v20 }
  0x53   :  { %1003 = vmatmul.msk.f32.gmra.mxu0 %vm80_vm1, %v61_v21  ;;  %1016 = vmatmul.msk.f32.gmra.mxu3 %vm80_vm1, %v74_v22 }
  0x5b   :  { %1004 = vmatmul.msk.f32.gmra.mxu0 %vm80_vm1, %v62_v23 }
  0x63   :  { %1005 = vmatmul.msk.f32.gmra.mxu0 %vm80_vm1, %v63_v24  ;;  %vm814_vm1 = vcmask 261120  }
  0x80   :  { %v174_v25 = vpop.f32.mrf.mxu0 }
  0x81   :  { %v175_v28 = vadd.f32 %v1289_v26, %v174_v25 }
  0x83   :  { %v246_v31 = vmax.f32 %v175_v28, 0.0 }
  0x86   :  { %v213_v27 = vpop.f32.mrf.mxu3 }
  0x87   :  { %v214_v19 = vadd.f32 %v1289_v26, %v213_v27 }
  0x88   :  { %v177_v29 = vpop.f32.mrf.mxu0 }
  0x89   :  { %v178_v30 = vadd.f32 %v1289_v26, %v177_v29 }
  0x8b   :  { %v247_v32 = vmax.f32 %v178_v30, 0.0 }
  0x8d   :  { %v1293_v33 = vmax.f32 %v246_v31, %v247_v32 }
  0x8e   :  { %v216_v34 = vpop.f32.mrf.mxu3 }
  0x8f   :  { %v283_v44 = vsel %vm282_vm2, %v1293_v33, 0.0  ;;  %v217_v14 = vadd.f32 %v1289_v26, %v216_v34  ;;  %v259_v34 = vmax.f32 %v214_v19, 0.0 }
  0x90   :  { %v180_v35 = vpop.f32.mrf.mxu0 }
  0x91   :  { %v181_v37 = vadd.f32 %v1289_v26, %v180_v35  ;;  %v260_v24 = vmax.f32 %v217_v14, 0.0 }
  0x93   :  { %v248_v40 = vmax.f32 %v181_v37, 0.0 }
  0x96   :  { %v219_v36 = vpop.f32.mrf.mxu3 }
  0x97   :  { %v220_v15 = vadd.f32 %v1289_v26, %v219_v36 }
  0x98   :  { %v183_v38 = vpop.f32.mrf.mxu0 }
  0x99   :  { %v184_v39 = vadd.f32 %v1289_v26, %v183_v38  ;;  %v261_v25 = vmax.f32 %v220_v15, 0.0 }
  0x9b   :  { %v249_v41 = vmax.f32 %v184_v39, 0.0 }
  0x9d   :  { %v1297_v42 = vmax.f32 %v248_v40, %v249_v41 }
  0x9e   :  { %v222_v43 = vpop.f32.mrf.mxu3 }
  0x9f   :  { %v284_v45 = vsel %vm282_vm2, %v1297_v42, 0.0  ;;  %v223_v20 = vadd.f32 %v1289_v26, %v222_v43 }
  0xa0   :  { %v285_v46 = vadd.f32 %v284_v45, %v283_v44  ;;  %v186_v47 = vpop.f32.mrf.mxu0  ;;  %v277_v44 = vmax.f32 %v260_v24, %v261_v25 }
  0xa1   :  { %v187_v60 = vadd.f32 %v1289_v26, %v186_v47  ;;  %v262_v35 = vmax.f32 %v223_v20, 0.0 }
  0xa3   :  { %v250_v1 = vmax.f32 %v187_v60, 0.0 }
  0xa6   :  { %v225_v48 = vpop.f32.mrf.mxu3 }
  0xa7   :  { %v226_v21 = vadd.f32 %v1289_v26, %v225_v48 }
  0xa8   :  { %v189_v49 = vpop.f32.mrf.mxu0 }
  0xa9   :  { %v190_v58 = vadd.f32 %v1289_v26, %v189_v49  ;;  %v263_v36 = vmax.f32 %v226_v21, 0.0 }
  0xab   :  { %v251_v62 = vmax.f32 %v190_v58, 0.0 }
  0xad   :  { %v1309_v4 = vmax.f32 %v250_v1, %v251_v62 }
  0xae   :  { %v228_v51 = vpop.f32.mrf.mxu3 }
  0xaf   :  { %v286_v16 = vsel %vm282_vm2, %v1309_v4, 0.0  ;;  %v229_v29 = vadd.f32 %v1289_v26, %v228_v51 }
  0xb0   :  { %v192_v50 = vpop.f32.mrf.mxu0  ;;  %v287_v28 = vadd.f32 %v286_v16, %v285_v46 }
  0xb1   :  { %v193_v63 = vadd.f32 %v1289_v26, %v192_v50  ;;  %v264_v45 = vmax.f32 %v229_v29, 0.0 }
  0xb3   :  { %v252_v7 = vmax.f32 %v193_v63, 0.0 }
  0xb6   :  { %v231_v53 = vpop.f32.mrf.mxu3 }
  0xb7   :  { %v232_v31 = vadd.f32 %v1289_v26, %v231_v53 }
  0xb8   :  { %v195_v52 = vpop.f32.mrf.mxu0 }
  0xb9   :  { %v196_v61 = vadd.f32 %v1289_v26, %v195_v52  ;;  %v265_v47 = vmax.f32 %v232_v31, 0.0  ;;  %v278_v52 = vmax.f32 %v262_v35, %v263_v36 }
  0xbb   :  { %v253_v2 = vmax.f32 %v196_v61, 0.0  ;;  %v279_v58 = vmax.f32 %v264_v45, %v265_v47  ;;  %v298_v62 = vsel %vm282_vm2, %v278_v52, 0.0 }
  0xbd   :  { %v1313_v11 = vmax.f32 %v252_v7, %v253_v2  ;;  %v300_v1 = vsel %vm282_vm2, %v279_v58, 0.0 }
  0xbe   :  { %v234_v55 = vpop.f32.mrf.mxu3 }
  0xbf   :  { %v288_v22 = vsel %vm282_vm2, %v1313_v11, 0.0  ;;  %v235_v39 = vadd.f32 %v1289_v26, %v234_v55 }
  0xc0   :  { %v198_v54 = vpop.f32.mrf.mxu0  ;;  %v289_v37 = vadd.f32 %v288_v22, %v287_v28 }
  0xc1   :  { %v199_v3 = vadd.f32 %v1289_v26, %v198_v54  ;;  %v266_v53 = vmax.f32 %v235_v39, 0.0 }
  0xc3   :  { %v254_v12 = vmax.f32 %v199_v3, 0.0 }
  0xc6   :  { %v237_v57 = vpop.f32.mrf.mxu3 }
  0xc7   :  { %v238_v40 = vadd.f32 %v1289_v26, %v237_v57  ;;  %v296_v57 = vsel %vm282_vm2, %v277_v44, 0.0 }
  0xc8   :  { %v201_v56 = vpop.f32.mrf.mxu0 }
  0xc9   :  { %v202_v0 = vadd.f32 %v1289_v26, %v201_v56  ;;  %v267_v54 = vmax.f32 %v238_v40, 0.0 }
  0xcb   :  { %v255_v8 = vmax.f32 %v202_v0, 0.0  ;;  %v280_v63 = vmax.f32 %v266_v53, %v267_v54 }
  0xcd   :  { %v1319_v17 = vmax.f32 %v254_v12, %v255_v8  ;;  %v302_v3 = vsel %vm282_vm2, %v280_v63, 0.0 }
  0xce   :  { %v240_v6 = vpop.f32.mrf.mxu3 }
  0xcf   :  { %v290_v27 = vsel %vm282_vm2, %v1319_v17, 0.0  ;;  %v241_v48 = vadd.f32 %v1289_v26, %v240_v6 }
  0xd0   :  { %v204_v59 = vpop.f32.mrf.mxu0  ;;  %v291_v46 = vadd.f32 %v290_v27, %v289_v37 }
  0xd1   :  { %v205_v9 = vadd.f32 %v1289_v26, %v204_v59  ;;  %v268_v59 = vmax.f32 %v241_v48, 0.0 }
  0xd3   :  { %v256_v18 = vmax.f32 %v205_v9, 0.0 }
  0xd6   :  { %v243_v38 = vpop.f32.mrf.mxu3 }
  0xd7   :  { %v244_v50 = vadd.f32 %v1289_v26, %v243_v38 }
  0xd8   :  { %v207_v5 = vpop.f32.mrf.mxu0 }
  0xd9   :  { %v208_v10 = vadd.f32 %v1289_v26, %v207_v5  ;;  %v269_v60 = vmax.f32 %v244_v50, 0.0 }
  0xdb   :  { %v257_v13 = vmax.f32 %v208_v10, 0.0 }
  0xdd   :  { %v1326_v23 = vmax.f32 %v256_v18, %v257_v13 }
  0xdf   :  { %v292_v41 = vsel %vm282_vm2, %v1326_v23, 0.0 }
  0xe0   :  { %v210_v30 = vpop.f32.mrf.mxu0  ;;  %v293_v51 = vadd.f32 %v292_v41, %v291_v46 }
  0xe1   :  { %v211_v32 = vadd.f32 %v1289_v26, %v210_v30  ;;  %v281_v26 = vmax.f32 %v268_v59, %v269_v60 }
  0xe3   :  { %v258_v43 = vmax.f32 %v211_v32, 0.0  ;;  %v304_v6 = vsel %vm282_vm2, %v281_v26, 0.0 }
  0xe5   :  { %v276_v49 = vmax.f32 %v258_v43, %v259_v34 }
  0xe7   :  { %v294_v55 = vsel %vm282_vm2, %v276_v49, 0.0 }
  0xe8   :  { %v295_v56 = vadd.f32 %v294_v55, %v293_v51 }
  0xea   :  { %v297_v61 = vadd.f32 %v296_v57, %v295_v56 }
  0xec   :  { %v299_v0 = vadd.f32 %v298_v62, %v297_v61 }
  0xee   :  { %v301_v2 = vadd.f32 %v300_v1, %v299_v0 }
  0xf0   :  { %v303_v5 = vadd.f32 %v302_v3, %v301_v2 }
  0xf2   :  { %v305_v7 = vadd.f32 %v304_v6, %v303_v5 }
  0xf4   :  { %v306_v8 = vrot.slane %v305_v7, 4 }
  0xf6   :  { %v307_v9 = vadd.f32 %v306_v8, %v305_v7 }
  0xf8   :  { %v308_v10 = vrot.slane %v307_v9, 2 }
  0xfa   :  { %v309_v12 = vadd.f32 %v308_v10, %v307_v9 }
  0xfc   :  { %v310_v13 = vrot.slane %v309_v12, 1 }
  0xfe   :  { %v311_v14 = vadd.f32 %v310_v13, %v309_v12  ;;  %v378_v13 = vld [vmem:[%s1775_s3] sm:$0x1]  ;;  %s1097_s3 = smov 72  }
 0x100   :  { %v312_v15 = vmul.f32 0.010416667, %v311_v14 }
 0x102   :  { %v1346_v16 = vsub.f32 %v1293_v33, %v312_v15  ;;  %v1349_v18 = vsub.f32 %v1297_v42, %v312_v15  ;;  %v1352_v19 = vsub.f32 %v1309_v4, %v312_v15  ;;  %v1354_v20 = vsub.f32 %v276_v49, %v312_v15 }
 0x103   :  { %v1356_v21 = vsub.f32 %v277_v44, %v312_v15  ;;  %v1359_v22 = vsub.f32 %v1313_v11, %v312_v15  ;;  %v317_v25 = vsub.f32 %v1319_v17, %v312_v15  ;;  %v1369_v4 = vsub.f32 %v1326_v23, %v312_v15 }
 0x104   :  { %v325_v24 = vmul.f32 %v1346_v16, %v1346_v16  ;;  %v326_v33 = vmul.f32 %v1349_v18, %v1349_v18  ;;  %v327_v42 = vmul.f32 %v1352_v19, %v1352_v19  ;;  %v321_v23 = vsub.f32 %v278_v52, %v312_v15 }
 0x105   :  { %v328_v28 = vmul.f32 %v1359_v22, %v1359_v22  ;;  %v329_v31 = vmul.f32 %v317_v25, %v317_v25  ;;  %v330_v17 = vmul.f32 %v1369_v4, %v1369_v4  ;;  %v331_v36 = vmul.f32 %v1354_v20, %v1354_v20 }
 0x106   :  { %v337_v11 = vsel %vm282_vm2, %v325_v24, 0.0  ;;  %v338_v29 = vsel %vm282_vm2, %v326_v33, 0.0  ;;  %v340_v27 = vsel %vm282_vm2, %v327_v42, 0.0  ;;  %v1382_v39 = vsub.f32 %v279_v58, %v312_v15  ;;  %v1055_v33 = vld [vmem:[%s1776_s4] ss:$0 sm:$0xff]  ;;  %s1098_s4 = smov 100  }
 0x107   :  { %v339_v30 = vadd.f32 %v338_v29, %v337_v11  ;;  %v342_v34 = vsel %vm282_vm2, %v328_v28, 0.0  ;;  %v344_v37 = vsel %vm282_vm2, %v329_v31, 0.0  ;;  %v332_v40 = vmul.f32 %v1356_v21, %v1356_v21 }
 0x108   :  { %v346_v41 = vsel %vm282_vm2, %v330_v17, 0.0  ;;  %v1387_v44 = vsub.f32 %v280_v63, %v312_v15  ;;  %v333_v45 = vmul.f32 %v321_v23, %v321_v23  ;;  %v348_v46 = vsel %vm282_vm2, %v331_v36, 0.0 }
 0x109   :  { %v341_v32 = vadd.f32 %v340_v27, %v339_v30  ;;  %v324_v48 = vsub.f32 %v281_v26, %v312_v15  ;;  %v334_v49 = vmul.f32 %v1382_v39, %v1382_v39  ;;  %v350_v50 = vsel %vm282_vm2, %v332_v40, 0.0 }
 0x10a   :  { %v335_v52 = vmul.f32 %v1387_v44, %v1387_v44  ;;  %v352_v53 = vsel %vm282_vm2, %v333_v45, 0.0 }
 0x10b   :  { %v343_v35 = vadd.f32 %v342_v34, %v341_v32  ;;  %v336_v55 = vmul.f32 %v324_v48, %v324_v48  ;;  %v354_v56 = vsel %vm282_vm2, %v334_v49, 0.0  ;;  %v564_v49 = vld [vmem:[%s1777_s5 + $0x68] sm:$0xff] }
 0x10c   :  { %v356_v58 = vsel %vm282_vm2, %v335_v52, 0.0  ;;  %v578_v52 = vld [vmem:[%s1777_s5 + $0xd8] sm:$0xff] }
 0x10d   :  { %v345_v38 = vadd.f32 %v344_v37, %v343_v35  ;;  %v358_v60 = vsel %vm282_vm2, %v336_v55, 0.0  ;;  %v561_v55 = vld [vmem:[%s1777_s5 + $0x50] sm:$0xff] }
 0x10f   :  { %v347_v43 = vadd.f32 %v346_v41, %v345_v38 }
 0x111   :  { %v349_v47 = vadd.f32 %v348_v46, %v347_v43  ;;  %v566_v46 = vld [vmem:[%s1777_s5 + $0x78] sm:$0xff] }
 0x112   :  { %616 = vmatpush.msra.mxu1 %v566_v46 }
 0x113   :  { %v351_v51 = vadd.f32 %v350_v50, %v349_v47  ;;  %v565_v47 = vld [vmem:[%s1777_s5 + $0x70] sm:$0xff]  ;;  %v579_v50 = vld [vmem:[%s1777_s5 + $0xe0] sm:$0xff] }
 0x114   :  { %617 = vmatpush.msra.mxu1 %v565_v47 }
 0x115   :  { %v353_v54 = vadd.f32 %v352_v53, %v351_v51  ;;  %v563_v51 = vld [vmem:[%s1777_s5 + $0x60] sm:$0xff]  ;;  %v562_v53 = vld [vmem:[%s1777_s5 + $0x58] sm:$0xff] }
 0x116   :  { %618 = vmatpush.msra.mxu1 %v564_v49 }
 0x117   :  { %v355_v57 = vadd.f32 %v354_v56, %v353_v54  ;;  %v577_v54 = vld [vmem:[%s1777_s5 + $0xd0] sm:$0xff]  ;;  %v576_v56 = vld [vmem:[%s1777_s5 + $0xc8] sm:$0xff] }
 0x118   :  { %619 = vmatpush.msra.mxu1 %v563_v51 }
 0x119   :  { %v357_v59 = vadd.f32 %v356_v58, %v355_v57  ;;  %v560_v57 = vld [vmem:[%s1777_s5 + $0x48] sm:$0xff]  ;;  %v575_v58 = vld [vmem:[%s1777_s5 + $0xc0] sm:$0xff] }
 0x11a   :  { %620 = vmatpush.msra.mxu1 %v562_v53 }
 0x11b   :  { %v359_v61 = vadd.f32 %v358_v60, %v357_v59  ;;  %v559_v59 = vld [vmem:[%s1777_s5 + $0x40] sm:$0xff]  ;;  %v574_v60 = vld [vmem:[%s1777_s5 + $0xb8] sm:$0xff] }
 0x11c   :  { %621 = vmatpush.msra.mxu1 %v561_v55 }
 0x11d   :  { %v360_v62 = vrot.slane %v359_v61, 4 }
 0x11e   :  { %622 = vmatpush.msra.mxu1 %v560_v57 }
 0x11f   :  { %v361_v63 = vadd.f32 %v360_v62, %v359_v61  ;;  %v558_v61 = vld [vmem:[%s1777_s5 + $0x38] sm:$0xff]  ;;  %v573_v62 = vld [vmem:[%s1777_s5 + $0xb0] sm:$0xff] }
 0x120   :  { %623 = vmatpush.msra.mxu1 %v559_v59 }
 0x121   :  { %v362_v0 = vrot.slane %v361_v63, 2 }
 0x122   :  { %624 = vmatpush.msra.mxu1 %v558_v61 }
 0x123   :  { %v363_v1 = vadd.f32 %v362_v0, %v361_v63  ;;  %v557_v63 = vld [vmem:[%s1777_s5 + $0x30] sm:$0xff]  ;;  %v572_v0 = vld [vmem:[%s1777_s5 + $0xa8] sm:$0xff] }
 0x124   :  { %625 = vmatpush.msra.mxu1 %v557_v63 }
 0x125   :  { %v364_v26 = vrot.slane %v363_v1, 1 }
 0x127   :  { %v365_v2 = vadd.f32 %v364_v26, %v363_v1  ;;  %v556_v1 = vld [vmem:[%s1777_s5 + $0x28] sm:$0xff]  ;;  %v571_v26 = vld [vmem:[%s1777_s5 + $0xa0] sm:$0xff] }
 0x128   :  { %626 = vmatpush.msra.mxu1 %v556_v1 }
 0x129   :  { %v366_v3 = vmul.f32 0.010416667, %v365_v2  ;;  %v555_v2 = vld [vmem:[%s1777_s5 + $0x20] sm:$0xff] }
 0x12a   :  { %627 = vmatpush.msra.mxu1 %v555_v2 }
 0x12b   :  { %v367_v5 = vadd.f32 1e-05, %v366_v3  ;;  %v570_v3 = vld [vmem:[%s1777_s5 + $0x98] sm:$0xff] }
 0x12d   :  { %1061 = vrsqrt.f32 %v367_v5  ;;  %vm374_vm4 = vweird.f32 %v367_v5 }
 0x133   :  { %v1062_v6 = vpop.eup %1061 }
 0x134   :  { %v369_v7 = vmul.f32 %v1062_v6, %v367_v5  ;;  %vm375_vm3 = vweird.f32 %v1062_v6  ;;  %v554_v5 = vld [vmem:[%s1777_s5 + $0x18] sm:$0xff] }
 0x135   :  { %vm376_vm5 = vmor %vm374_vm4, %vm375_vm3  ;;  %628 = vmatpush.msra.mxu1 %v554_v5 }
 0x136   :  { %v370_v8 = vmul.f32 %v1062_v6, %v369_v7  ;;  %v553_v7 = vld [vmem:[%s1777_s5 + $0x10] sm:$0xff] }
 0x137   :  { %629 = vmatpush.msra.mxu1 %v553_v7 }
 0x138   :  { %v371_v9 = vmul.f32 0.5, %v370_v8  ;;  %v568_v8 = vld [vmem:[%s1777_s5 + $0x88] sm:$0xff] }
 0x13a   :  { %v372_v10 = vsub.f32 1.5, %v371_v9  ;;  %v552_v9 = vld [vmem:[%s1777_s5 + $0x8] sm:$0xff] }
 0x13b   :  { %630 = vmatpush.msra.mxu1 %v552_v9 }
 0x13c   :  { %v373_v12 = vmul.f32 %v1062_v6, %v372_v10  ;;  %v567_v10 = vld [vmem:[%s1777_s5 + $0x80] sm:$0xff] }
 0x13e   :  { %v377_v14 = vsel %vm376_vm5, %v1062_v6, %v373_v12  ;;  %v569_v6 = vld [vmem:[%s1777_s5 + $0x90] sm:$0xff]  ;;  %v551_v12 = vld [vmem:[%s1777_s5] sm:$0xff] }
 0x13f   :  { %v379_v15 = vmul.f32 %v378_v13, %v377_v14  ;;  %631 = vmatpush.msra.mxu1 %v551_v12 }
 0x141   :  { %v380_v24 = vperm.slane %v379_v15, 0 }
 0x143   :  { %v385_v42 = vmul.f32 %v380_v24, %v317_v25  ;;  %v384_v28 = vmul.f32 %v380_v24, %v1359_v22  ;;  %v383_v11 = vmul.f32 %v380_v24, %v1352_v19  ;;  %v382_v29 = vmul.f32 %v380_v24, %v1349_v18 }
 0x144   :  { %v386_v30 = vmul.f32 %v380_v24, %v1369_v4  ;;  %v387_v31 = vmul.f32 %v380_v24, %v1354_v20  ;;  %v388_v27 = vmul.f32 %v380_v24, %v1356_v21  ;;  %v389_v32 = vmul.f32 %v380_v24, %v321_v23 }
 0x145   :  { %v1411_v17 = vadd.f32 %v1055_v33, %v385_v42  ;;  %v1413_v34 = vadd.f32 %v1055_v33, %v384_v28  ;;  %v1415_v35 = vadd.f32 %v1055_v33, %v383_v11  ;;  %v392_v18 = vmul.f32 %v380_v24, %v324_v48  ;;  %v580_v48 = vld [vmem:[%s1777_s5 + $0xe8] sm:$0xff] }
 0x146   :  { %v381_v19 = vmul.f32 %v380_v24, %v1346_v16  ;;  %v1424_v20 = vadd.f32 %v1055_v33, %v382_v29  ;;  %v1437_v16 = vadd.f32 %v1055_v33, %v386_v30  ;;  %v1447_v23 = vadd.f32 %v1055_v33, %v387_v31 }
 0x147   :  { %492 = vrot.lane.b32.xlu1 %v1411_v17, %s1097_s3  ;;  %444 = vrot.lane.b32.xlu2 %v1413_v34, %s1098_s4  ;;  %v1426_v21 = vadd.f32 %v1055_v33, %v392_v18  ;;  %v1044_v4 = vpack.i.bf16 %v1411_v17, %v1413_v34  ;;  %v1454_v36 = vadd.f32 %v1055_v33, %v388_v27 }
 0x148   :  { %442 = vrot.lane.b32.xlu0 %v1415_v35, %s1098_s4  ;;  %v1428_v22 = vadd.f32 %v1055_v33, %v381_v19  ;;  %v1039_v25 = vpack.i.bf16 %v1415_v35, %v1424_v20  ;;  %v1049_v37 = vpack.i.bf16 %v1447_v23, %v1437_v16  ;;  %v405_v38 = vadd.f32 %v1055_v33, %v389_v32 }
 0x149   :  { %v390_v40 = vmul.f32 %v380_v24, %v1382_v39  ;;  %v391_v43 = vmul.f32 %v380_v24, %v1387_v44  ;;  %v582_v39 = vld [vmem:[%s1777_s5 + $0xf8] sm:$0x3]  ;;  %v581_v44 = vld [vmem:[%s1777_s5 + $0xf0] sm:$0xff] }
 0x14a   :  { %1017 = vmatpush.msk.msra.mxu2 %vm612_vm6, %v582_v39 }
 0x14b   :  { %v406_v41 = vadd.f32 %v1055_v33, %v390_v40  ;;  %v407_v45 = vadd.f32 %v1055_v33, %v391_v43 }
 0x14c   :  { %658 = vmatpush.msra.mxu2 %v581_v44 }
 0x14e   :  { %659 = vmatpush.msra.mxu2 %v580_v48 }
 0x14f   :  { %469 = vrot.lane.b32.xlu2 %v1411_v17, %s1099_s24  ;;  %1040 = vrot.lane.b32.xlu1 %v1039_v25, %s1100_s25 }
 0x150   :  { %467 = vrot.lane.b32.xlu0 %v1413_v34, %s1099_s24  ;;  %660 = vmatpush.msra.mxu2 %v579_v50 }
 0x152   :  { %661 = vmatpush.msra.mxu2 %v578_v52 }
 0x154   :  { %662 = vmatpush.msra.mxu2 %v577_v54 }
 0x156   :  { %663 = vmatpush.msra.mxu2 %v576_v56 }
 0x157   :  { %471 = vrot.lane.b32.xlu2 %v1437_v16, %s1099_s24  ;;  %446 = vrot.lane.b32.xlu1 %v1411_v17, %s1098_s4 }
 0x158   :  { %494 = vrot.lane.b32.xlu0 %v1437_v16, %s1097_s3  ;;  %664 = vmatpush.msra.mxu2 %v575_v58 }
 0x15a   :  { %665 = vmatpush.msra.mxu2 %v574_v60 }
 0x15c   :  { %666 = vmatpush.msra.mxu2 %v573_v62 }
 0x15e   :  { %667 = vmatpush.msra.mxu2 %v572_v0 }
 0x15f   :  { %448 = vrot.lane.b32.xlu2 %v1437_v16, %s1098_s4  ;;  %1045 = vrot.lane.b32.xlu1 %v1044_v4, %s1100_s25 }
 0x160   :  { %496 = vrot.lane.b32.xlu0 %v1447_v23, %s1097_s3  ;;  %668 = vmatpush.msra.mxu2 %v571_v26 }
 0x162   :  { %669 = vmatpush.msra.mxu2 %v570_v3 }
 0x164   :  { %670 = vmatpush.msra.mxu2 %v569_v6 }
 0x166   :  { %671 = vmatpush.msra.mxu2 %v568_v8 }
 0x167   :  { %450 = vrot.lane.b32.xlu2 %v1447_v23, %s1098_s4  ;;  %498 = vrot.lane.b32.xlu1 %v1454_v36, %s1097_s3 }
 0x168   :  { %473 = vrot.lane.b32.xlu0 %v1447_v23, %s1099_s24  ;;  %672 = vmatpush.msra.mxu2 %v567_v10 }
 0x16f   :  { %1050 = vrot.lane.b32.xlu2 %v1049_v37, %s1100_s25  ;;  %500 = vrot.lane.b32.xlu1 %v405_v38, %s1097_s3 }
 0x170   :  { %475 = vrot.lane.b32.xlu0 %v1454_v36, %s1099_s24 }
 0x177   :  { %502 = vrot.lane.b32.xlu2 %v406_v41, %s1097_s3  ;;  %477 = vrot.lane.b32.xlu1 %v405_v38, %s1099_s24 }
 0x178   :  { %452 = vrot.lane.b32.xlu0 %v1454_v36, %s1098_s4 }
 0x17f   :  { %504 = vrot.lane.b32.xlu2 %v407_v45, %s1097_s3  ;;  %479 = vrot.lane.b32.xlu1 %v406_v41, %s1099_s24 }
 0x180   :  { %454 = vrot.lane.b32.xlu0 %v405_v38, %s1098_s4 }
 0x187   :  { %481 = vrot.lane.b32.xlu2 %v407_v45, %s1099_s24  ;;  %456 = vrot.lane.b32.xlu1 %v406_v41, %s1098_s4 }
 0x188   :  { %429 = vrot.lane.b32.xlu0 %v1454_v36, %s1100_s25 }
 0x18f   :  { %431 = vrot.lane.b32.xlu1 %v405_v38, %s1100_s25  ;;  %s1102_s25 = smov 80  }
 0x190   :  { %506 = vrot.lane.b32.xlu0 %v1426_v21, %s1097_s3 }
 0x1a1   :  { %v445_v13 = vpop.permute.xlu2 %444 }
 0x1a9   :  { %v470_v14 = vpop.permute.xlu2 %469 }
 0x1aa   :  { %v535_v21 = vsel %vm533_vm8, %v445_v13, %v470_v14 }
 0x1b1   :  { %v472_v33 = vpop.permute.xlu2 %471 }
 0x1b9   :  { %v493_v15 = vpop.permute.xlu1 %492  ;;  %v449_v18 = vpop.permute.xlu2 %448 }
 0x1ba   :  { %v443_v24 = vpop.permute.xlu0 %442 }
 0x1c1   :  { %v1041_v42 = vpop.permute.xlu1 %1040  ;;  %v451_v38 = vpop.permute.xlu2 %450 }
 0x1c2   :  { %v468_v28 = vpop.permute.xlu0 %467  ;;  %v1042_v11 = vunpack.i.l.bf16 %v1041_v42  ;;  %v1043_v32 = vunpack.i.h.bf16 %v1041_v42 }
 0x1c3   :  { %v534_v29 = vsel %vm533_vm8, %v443_v24, %v468_v28 }
 0x1c4   :  { %v543_v30 = vsel %vm542_vm7, %v534_v29, %v493_v15  ;;  %v516_v31 = vsel %vm282_vm2, %v1428_v22, %v1042_v11  ;;  %v517_v4 = vsel %vm282_vm2, %v1424_v20, %v1043_v32 }
 0x1c5   :  { %1018 = vmatmul.msk.f32.vlgmr.msra.gmra.mxu2 %vm587_vm9, %v543_v30  ;;  %v525_v27 = vsel %vm524_vm10, %v516_v31, %v443_v24  ;;  %v526_v22 = vsel %vm524_vm10, %v517_v4, %v445_v13 }
 0x1c6   :  { %632 = vmatmul.f32.vlgmr.msra.gmra.mxu1 %v525_v27 }
 0x1c9   :  { %v447_v19 = vpop.permute.xlu1 %446  ;;  %v1051_v50 = vpop.permute.xlu2 %1050 }
 0x1ca   :  { %v495_v25 = vpop.permute.xlu0 %494  ;;  %v536_v41 = vsel %vm533_vm8, %v447_v19, %v472_v33  ;;  %v1052_v53 = vunpack.i.l.bf16 %v1051_v50  ;;  %v1053_v59 = vunpack.i.h.bf16 %v1051_v50 }
 0x1cb   :  { %v544_v37 = vsel %vm542_vm7, %v535_v21, %v495_v25 }
 0x1cc   :  { %v520_v56 = vsel %vm282_vm2, %v1411_v17, %v1052_v53  ;;  %v521_v17 = vsel %vm282_vm2, %v1437_v16, %v1053_v59 }
 0x1cd   :  { %1019 = vmatmul.msk.f32.gmra.mxu2 %vm587_vm9, %v544_v37  ;;  %v529_v58 = vsel %vm524_vm10, %v520_v56, %v451_v38 }
 0x1ce   :  { %635 = vmatmul.f32.gmra.mxu1 %v526_v22 }
 0x1d1   :  { %v1046_v40 = vpop.permute.xlu1 %1045  ;;  %v503_v60 = vpop.permute.xlu2 %502 }
 0x1d2   :  { %v497_v43 = vpop.permute.xlu0 %496  ;;  %v1047_v45 = vunpack.i.l.bf16 %v1046_v40  ;;  %v1048_v44 = vunpack.i.h.bf16 %v1046_v40 }
 0x1d3   :  { %v545_v39 = vsel %vm542_vm7, %v536_v41, %v497_v43 }
 0x1d4   :  { %v518_v46 = vsel %vm282_vm2, %v1415_v35, %v1047_v45  ;;  %v519_v49 = vsel %vm282_vm2, %v1413_v34, %v1048_v44 }
 0x1d5   :  { %1020 = vmatmul.msk.f32.gmra.mxu2 %vm587_vm9, %v545_v39  ;;  %v527_v20 = vsel %vm524_vm10, %v518_v46, %v447_v19  ;;  %v528_v35 = vsel %vm524_vm10, %v519_v49, %v449_v18 }
 0x1d6   :  { %638 = vmatmul.f32.gmra.mxu1 %v527_v20 }
 0x1d9   :  { %v499_v47 = vpop.permute.xlu1 %498  ;;  %v505_v3 = vpop.permute.xlu2 %504 }
 0x1da   :  { %v474_v48 = vpop.permute.xlu0 %473 }
 0x1db   :  { %v537_v51 = vsel %vm533_vm8, %v449_v18, %v474_v48 }
 0x1dc   :  { %v546_v52 = vsel %vm542_vm7, %v537_v51, %v499_v47 }
 0x1dd   :  { %1021 = vmatmul.msk.f32.gmra.mxu2 %vm587_vm9, %v546_v52 }
 0x1de   :  { %641 = vmatmul.f32.gmra.mxu1 %v528_v35 }
 0x1e1   :  { %v501_v54 = vpop.permute.xlu1 %500  ;;  %v482_v10 = vpop.permute.xlu2 %481 }
 0x1e2   :  { %v476_v55 = vpop.permute.xlu0 %475 }
 0x1e3   :  { %v538_v57 = vsel %vm533_vm8, %v451_v38, %v476_v55 }
 0x1e4   :  { %v547_v34 = vsel %vm542_vm7, %v538_v57, %v501_v54 }
 0x1e5   :  { %1022 = vmatmul.msk.f32.gmra.mxu2 %vm587_vm9, %v547_v34 }
 0x1e6   :  { %644 = vmatmul.f32.gmra.mxu1 %v529_v58 }
 0x1e9   :  { %v478_v61 = vpop.permute.xlu1 %477 }
 0x1ea   :  { %v453_v62 = vpop.permute.xlu0 %452 }
 0x1eb   :  { %v539_v63 = vsel %vm533_vm8, %v453_v62, %v478_v61  ;;  %v530_v1 = vsel %vm524_vm10, %v521_v17, %v453_v62 }
 0x1ec   :  { %v548_v0 = vsel %vm542_vm7, %v539_v63, %v503_v60 }
 0x1ed   :  { %1023 = vmatmul.msk.f32.gmra.mxu2 %vm587_vm9, %v548_v0 }
 0x1ee   :  { %647 = vmatmul.f32.gmra.mxu1 %v530_v1 }
 0x1f1   :  { %v480_v26 = vpop.permute.xlu1 %479 }
 0x1f2   :  { %v455_v2 = vpop.permute.xlu0 %454 }
 0x1f3   :  { %v540_v5 = vsel %vm533_vm8, %v455_v2, %v480_v26 }
 0x1f4   :  { %v549_v6 = vsel %vm542_vm7, %v540_v5, %v505_v3 }
 0x1f5   :  { %1024 = vmatmul.msk.f32.gmra.mxu2 %vm587_vm9, %v549_v6 }
 0x1f9   :  { %v457_v7 = vpop.permute.xlu1 %456 }
 0x1fa   :  { %v430_v8 = vpop.permute.xlu0 %429  ;;  %v541_v13 = vsel %vm533_vm8, %v457_v7, %v482_v10 }
 0x1fb   :  { %v522_v9 = vsel %vm282_vm2, %v1447_v23, %v430_v8 }
 0x1fc   :  { %v531_v16 = vsel %vm524_vm10, %v522_v9, %v455_v2 }
 0x1fd   :  { %650 = vmatmul.f32.gmra.mxu1 %v531_v16 }
 0x201   :  { %v432_v12 = vpop.permute.xlu1 %431 }
 0x202   :  { %v507_v14 = vpop.permute.xlu0 %506  ;;  %v523_v15 = vsel %vm282_vm2, %v1454_v36, %v432_v12  ;;  %v1056_v36 = vld [vmem:[%s1778_s6] ss:$0 sm:$0xff]  ;;  %vm858_vm2 = vcmask 162816  }
 0x203   :  { %v550_v24 = vsel %vm542_vm7, %v541_v13, %v507_v14  ;;  %v532_v33 = vsel %vm524_vm10, %v523_v15, %v457_v7  ;;  %vm912_vm7 = vcmask 490496  }
 0x204   :  { %1025 = vmatmul.msk.f32.gmra.mxu2 %vm587_vm9, %v550_v24 }
 0x205   :  { %653 = vmatmul.f32.gmra.mxu1 %v532_v33 }
 0x243   :  { %v633_v42 = vpop.f32.mrf.mxu1 }
 0x244   :  { %v634_v41 = vadd.f32 %v1056_v36, %v633_v42 }
 0x248   :  { %v674_v23 = vpop.f32.mrf.mxu2 }
 0x249   :  { %v675_v44 = vadd.f32 %v674_v23, %v634_v41  ;;  %v803_v41 = vld [vmem:[%s1781_s9 + $0x68] sm:$0xff] }
 0x24b   :  { %v636_v28 = vpop.f32.mrf.mxu1  ;;  %v698_v53 = vmax.f32 %v675_v44, 0.0 }
 0x24c   :  { %v637_v37 = vadd.f32 %v1056_v36, %v636_v28 }
 0x250   :  { %v677_v11 = vpop.f32.mrf.mxu2 }
 0x251   :  { %v678_v43 = vadd.f32 %v677_v11, %v637_v37 }
 0x253   :  { %v639_v29 = vpop.f32.mrf.mxu1  ;;  %v699_v49 = vmax.f32 %v678_v43, 0.0 }
 0x254   :  { %v640_v22 = vadd.f32 %v1056_v36, %v639_v29 }
 0x255   :  { %v706_v56 = vmax.f32 %v698_v53, %v699_v49  ;;  %v795_v53 = vld [vmem:[%s1781_s9 + $0x28] sm:$0xff] }
 0x257   :  { %v711_v62 = vsel %vm710_vm11, %v706_v56, 0.0 }
 0x258   :  { %v680_v30 = vpop.f32.mrf.mxu2 }
 0x259   :  { %v681_v45 = vadd.f32 %v680_v30, %v640_v22  ;;  %v805_v22 = vld [vmem:[%s1781_s9 + $0x78] sm:$0xff] }
 0x25a   :  { %817 = vmatpush.msrb.mxu3 %v805_v22 }
 0x25b   :  { %v642_v31 = vpop.f32.mrf.mxu1  ;;  %v700_v50 = vmax.f32 %v681_v45, 0.0  ;;  %v802_v45 = vld [vmem:[%s1781_s9 + $0x60] sm:$0xff] }
 0x25c   :  { %v643_v25 = vadd.f32 %v1056_v36, %v642_v31 }
 0x260   :  { %v683_v27 = vpop.f32.mrf.mxu2 }
 0x261   :  { %v684_v38 = vadd.f32 %v683_v27, %v643_v25 }
 0x263   :  { %v645_v32 = vpop.f32.mrf.mxu1  ;;  %v701_v47 = vmax.f32 %v684_v38, 0.0  ;;  %v804_v38 = vld [vmem:[%s1781_s9 + $0x70] sm:$0xff] }
 0x264   :  { %v646_v39 = vadd.f32 %v1056_v36, %v645_v32  ;;  %818 = vmatpush.msrb.mxu3 %v804_v38 }
 0x265   :  { %v707_v54 = vmax.f32 %v700_v50, %v701_v47  ;;  %v797_v50 = vld [vmem:[%s1781_s9 + $0x38] sm:$0xff] }
 0x266   :  { %819 = vmatpush.msrb.mxu3 %v803_v41 }
 0x267   :  { %v712_v60 = vsel %vm710_vm11, %v707_v54, 0.0 }
 0x268   :  { %v686_v18 = vpop.f32.mrf.mxu2  ;;  %v713_v1 = vadd.f32 %v712_v60, %v711_v62  ;;  %820 = vmatpush.msrb.mxu3 %v802_v45 }
 0x269   :  { %v687_v48 = vadd.f32 %v686_v18, %v646_v39  ;;  %v801_v39 = vld [vmem:[%s1781_s9 + $0x58] sm:$0xff] }
 0x26a   :  { %821 = vmatpush.msrb.mxu3 %v801_v39 }
 0x26b   :  { %v648_v19 = vpop.f32.mrf.mxu1  ;;  %v702_v55 = vmax.f32 %v687_v48, 0.0  ;;  %v798_v48 = vld [vmem:[%s1781_s9 + $0x40] sm:$0xff] }
 0x26c   :  { %v649_v40 = vadd.f32 %v1056_v36, %v648_v19 }
 0x270   :  { %v689_v21 = vpop.f32.mrf.mxu2 }
 0x271   :  { %v690_v46 = vadd.f32 %v689_v21, %v649_v40 }
 0x273   :  { %v703_v51 = vmax.f32 %v690_v46, 0.0  ;;  %v800_v46 = vld [vmem:[%s1781_s9 + $0x50] sm:$0xff] }
 0x274   :  { %822 = vmatpush.msrb.mxu3 %v800_v46  ;;  %v923_v46 = vld [vmem:[%s1785_s13 + $0x48] sm:$0xff] }
 0x275   :  { %v708_v57 = vmax.f32 %v702_v55, %v703_v51  ;;  %v758_v55 = vld [vmem:[%s1779_s7] sm:$0x1]  ;;  %s1101_s7 = smov 120   ;;  %937 = vmatpush.msrb.mxu1 %v923_v46 }
 0x277   :  { %v714_v63 = vsel %vm710_vm11, %v708_v57, 0.0 }
 0x278   :  { %v692_v20 = vpop.f32.mrf.mxu2  ;;  %v715_v2 = vadd.f32 %v714_v63, %v713_v1 }
 0x27a   :  { %v651_v4 = vpop.f32.mrf.mxu1 }
 0x27b   :  { %v652_v52 = vadd.f32 %v1056_v36, %v651_v4 }
 0x27d   :  { %v693_v34 = vadd.f32 %v692_v20, %v652_v52  ;;  %v799_v20 = vld [vmem:[%s1781_s9 + $0x48] sm:$0xff]  ;;  %v796_v52 = vld [vmem:[%s1781_s9 + $0x30] sm:$0xff] }
 0x27e   :  { %823 = vmatpush.msrb.mxu3 %v799_v20  ;;  %v922_v20 = vld [vmem:[%s1785_s13 + $0x40] sm:$0xff] }
 0x27f   :  { %v704_v0 = vmax.f32 %v693_v34, 0.0  ;;  %938 = vmatpush.msrb.mxu1 %v922_v20 }
 0x280   :  { %824 = vmatpush.msrb.mxu3 %v798_v48  ;;  %v920_v48 = vld [vmem:[%s1785_s13 + $0x30] sm:$0xff] }
 0x282   :  { %v654_v35 = vpop.f32.mrf.mxu1  ;;  %825 = vmatpush.msrb.mxu3 %v797_v50  ;;  %v918_v50 = vld [vmem:[%s1785_s13 + $0x20] sm:$0xff] }
 0x283   :  { %v655_v58 = vadd.f32 %v1056_v36, %v654_v35 }
 0x284   :  { %826 = vmatpush.msrb.mxu3 %v796_v52 }
 0x286   :  { %827 = vmatpush.msrb.mxu3 %v795_v53 }
 0x287   :  { %v695_v59 = vpop.f32.mrf.mxu2 }
 0x288   :  { %v696_v61 = vadd.f32 %v695_v59, %v655_v58  ;;  %v1057_v59 = vld [vmem:[%s1780_s8] ss:$0 sm:$0xff] }
 0x28a   :  { %v705_v17 = vmax.f32 %v696_v61, 0.0 }
 0x28c   :  { %v709_v26 = vmax.f32 %v704_v0, %v705_v17 }
 0x28e   :  { %v716_v3 = vsel %vm710_vm11, %v709_v26, 0.0 }
 0x28f   :  { %v717_v5 = vadd.f32 %v716_v3, %v715_v2  ;;  %v793_v2 = vld [vmem:[%s1781_s9 + $0x18] sm:$0xff]  ;;  %v792_v3 = vld [vmem:[%s1781_s9 + $0x10] sm:$0xff] }
 0x291   :  { %v718_v6 = vrot.slane %v717_v5, 4 }
 0x293   :  { %v719_v7 = vadd.f32 %v718_v6, %v717_v5  ;;  %v791_v5 = vld [vmem:[%s1781_s9 + $0x8] sm:$0xff]  ;;  %v790_v6 = vld [vmem:[%s1781_s9] sm:$0xff] }
 0x295   :  { %v720_v8 = vrot.slane %v719_v7, 2 }
 0x297   :  { %v721_v9 = vadd.f32 %v720_v8, %v719_v7  ;;  %v809_v7 = vld [vmem:[%s1781_s9 + $0x98] sm:$0xff]  ;;  %v808_v8 = vld [vmem:[%s1781_s9 + $0x90] sm:$0xff] }
 0x299   :  { %v722_v16 = vrot.slane %v721_v9, 1 }
 0x29b   :  { %v723_v10 = vadd.f32 %v722_v16, %v721_v9  ;;  %v807_v9 = vld [vmem:[%s1781_s9 + $0x88] sm:$0xff]  ;;  %v806_v16 = vld [vmem:[%s1781_s9 + $0x80] sm:$0xff] }
 0x29d   :  { %v724_v12 = vmul.f32 0.03125, %v723_v10 }
 0x29f   :  { %v1636_v13 = vsub.f32 %v706_v56, %v724_v12  ;;  %v1638_v14 = vsub.f32 %v707_v54, %v724_v12  ;;  %v727_v15 = vsub.f32 %v708_v57, %v724_v12  ;;  %v728_v24 = vsub.f32 %v709_v26, %v724_v12  ;;  %v794_v56 = vld [vmem:[%s1781_s9 + $0x20] sm:$0xff] }
 0x2a0   :  { %828 = vmatpush.msrb.mxu3 %v794_v56  ;;  %v888_v56 = vld [vmem:[%s1783_s11] sm:$0x1] }
 0x2a1   :  { %v729_v33 = vmul.f32 %v1636_v13, %v1636_v13  ;;  %v730_v42 = vmul.f32 %v1638_v14, %v1638_v14  ;;  %v731_v23 = vmul.f32 %v727_v15, %v727_v15  ;;  %v732_v28 = vmul.f32 %v728_v24, %v728_v24 }
 0x2a2   :  { %829 = vmatpush.msrb.mxu3 %v793_v2  ;;  %v914_v2 = vld [vmem:[%s1785_s13] sm:$0xff] }
 0x2a3   :  { %v733_v11 = vsel %vm710_vm11, %v729_v33, 0.0  ;;  %v734_v29 = vsel %vm710_vm11, %v730_v42, 0.0  ;;  %v736_v31 = vsel %vm710_vm11, %v731_v23, 0.0  ;;  %v738_v32 = vsel %vm710_vm11, %v732_v28, 0.0  ;;  %v1058_v42 = vld [vmem:[%s1782_s10] ss:$0 sm:$0xff] }
 0x2a4   :  { %v735_v30 = vadd.f32 %v734_v29, %v733_v11  ;;  %830 = vmatpush.msrb.mxu3 %v792_v3 }
 0x2a6   :  { %v737_v27 = vadd.f32 %v736_v31, %v735_v30  ;;  %831 = vmatpush.msrb.mxu3 %v791_v5 }
 0x2a8   :  { %v739_v18 = vadd.f32 %v738_v32, %v737_v27  ;;  %832 = vmatpush.msrb.mxu3 %v790_v6 }
 0x2aa   :  { %v740_v19 = vrot.slane %v739_v18, 4  ;;  %849 = vmatpush.msra.mxu3 %v809_v7 }
 0x2ac   :  { %v741_v21 = vadd.f32 %v740_v19, %v739_v18  ;;  %850 = vmatpush.msra.mxu3 %v808_v8 }
 0x2ae   :  { %v742_v36 = vrot.slane %v741_v21, 2  ;;  %851 = vmatpush.msra.mxu3 %v807_v9 }
 0x2b0   :  { %v743_v25 = vadd.f32 %v742_v36, %v741_v21  ;;  %852 = vmatpush.msra.mxu3 %v806_v16  ;;  %v1060_v16 = vld [vmem:[%s1786_s14] ss:$0 sm:$0xff] }
 0x2b2   :  { %v744_v4 = vrot.slane %v743_v25, 1 }
 0x2b4   :  { %v745_v37 = vadd.f32 %v744_v4, %v743_v25 }
 0x2b6   :  { %v746_v40 = vmul.f32 0.03125, %v745_v37 }
 0x2b8   :  { %v747_v43 = vadd.f32 1e-05, %v746_v40 }
 0x2ba   :  { %1063 = vrsqrt.f32 %v747_v43  ;;  %vm754_vm13 = vweird.f32 %v747_v43 }
 0x2c0   :  { %v1064_v44 = vpop.eup %1063 }
 0x2c1   :  { %v749_v47 = vmul.f32 %v1064_v44, %v747_v43  ;;  %vm755_vm12 = vweird.f32 %v1064_v44 }
 0x2c2   :  { %vm756_vm14 = vmor %vm754_vm13, %vm755_vm12 }
 0x2c3   :  { %v750_v49 = vmul.f32 %v1064_v44, %v749_v47  ;;  %v921_v47 = vld [vmem:[%s1785_s13 + $0x38] sm:$0xff] }
 0x2c4   :  { %939 = vmatpush.msrb.mxu1 %v921_v47 }
 0x2c5   :  { %v751_v51 = vmul.f32 0.5, %v750_v49  ;;  %v919_v49 = vld [vmem:[%s1785_s13 + $0x28] sm:$0xff] }
 0x2c6   :  { %940 = vmatpush.msrb.mxu1 %v920_v48 }
 0x2c7   :  { %v752_v35 = vsub.f32 1.5, %v751_v51 }
 0x2c8   :  { %941 = vmatpush.msrb.mxu1 %v919_v49 }
 0x2c9   :  { %v753_v54 = vmul.f32 %v1064_v44, %v752_v35 }
 0x2ca   :  { %942 = vmatpush.msrb.mxu1 %v918_v50 }
 0x2cb   :  { %v757_v57 = vsel %vm756_vm14, %v1064_v44, %v753_v54 }
 0x2cc   :  { %v759_v34 = vmul.f32 %v758_v55, %v757_v57 }
 0x2ce   :  { %v760_v58 = vperm.slane %v759_v34, 0 }
 0x2d0   :  { %v764_v60 = vmul.f32 %v760_v58, %v728_v24  ;;  %v763_v61 = vmul.f32 %v760_v58, %v727_v15  ;;  %v762_v62 = vmul.f32 %v760_v58, %v1638_v14  ;;  %v761_v63 = vmul.f32 %v760_v58, %v1636_v13 }
 0x2d2   :  { %v772_v0 = vadd.f32 %v1057_v59, %v764_v60  ;;  %v771_v17 = vadd.f32 %v1057_v59, %v763_v61  ;;  %v770_v1 = vadd.f32 %v1057_v59, %v762_v62  ;;  %v769_v26 = vadd.f32 %v1057_v59, %v761_v63  ;;  %v1059_v59 = vld [vmem:[%s1784_s12] ss:$0 sm:$0xff] }
 0x2d4   :  { %782 = vrot.lane.b32.xlu1 %v772_v0, %s1101_s7  ;;  %778 = vrot.lane.b32.xlu0 %v771_v17, %s1102_s25  ;;  %v917_v17 = vld [vmem:[%s1785_s13 + $0x18] sm:$0xff] }
 0x2d5   :  { %774 = vrot.lane.b32.xlu2 %v770_v1, %s1103_s0  ;;  %v916_v1 = vld [vmem:[%s1785_s13 + $0x10] sm:$0xff]  ;;  %943 = vmatpush.msrb.mxu1 %v917_v17 }
 0x2d7   :  { %944 = vmatpush.msrb.mxu1 %v916_v1 }
 0x32f   :  { %v775_v10 = vpop.permute.xlu2 %774 }
 0x330   :  { %v785_v12 = vsel %vm710_vm11, %v769_v26, %v775_v10  ;;  %v915_v26 = vld [vmem:[%s1785_s13 + $0x8] sm:$0xff]  ;;  %s1106_s13 = smov [#allocation2]  }
 0x331   :  { %945 = vmatpush.msrb.mxu1 %v915_v26  ;;  %s981_s14 = sshll.u32 %s1106_s13, 4  ;;  %s982_s14 = int_to_ptr.vmem [resolvable:$true] %s981_s14 }
 0x333   :  { %946 = vmatpush.msrb.mxu1 %v914_v2 }
 0x346   :  { %v783_v13 = vpop.permute.xlu1 %782  ;;  %v779_v14 = vpop.permute.xlu0 %778 }
 0x347   :  { %v787_v15 = vsel %vm786_vm15, %v785_v12, %v779_v14 }
 0x348   :  { %v789_v24 = vsel %vm788_vm0, %v787_v15, %v783_v13 }
 0x349   :  { %833 = vmatmul.f32.vlgmr.msrb.gmra.mxu3 %v789_v24 }
 0x351   :  { %1026 = vmatmul.msk.f32.vlgmr.msra.gmra.mxu3 %vm814_vm1, %v783_v13 }
 0x3cc   :  { %v834_v33 = vpop.f32.mrf.mxu3 }
 0x3cd   :  { %v835_v23 = vadd.f32 %v1058_v42, %v834_v33 }
 0x3d4   :  { %v854_v28 = vpop.f32.mrf.mxu3 }
 0x3d5   :  { %v855_v11 = vadd.f32 %v854_v28, %v835_v23 }
 0x3d7   :  { %v857_v29 = vmax.f32 %v855_v11, 0.0 }
 0x3d9   :  { %v859_v30 = vsel %vm858_vm2, %v857_v29, 0.0 }
 0x3da   :  { %v860_v31 = vrot.slane %v859_v30, 4 }
 0x3dc   :  { %v861_v27 = vadd.f32 %v860_v31, %v859_v30 }
 0x3de   :  { %v862_v32 = vrot.slane %v861_v27, 2 }
 0x3e0   :  { %v863_v18 = vadd.f32 %v862_v32, %v861_v27 }
 0x3e2   :  { %v864_v19 = vrot.slane %v863_v18, 1 }
 0x3e4   :  { %v865_v21 = vadd.f32 %v864_v19, %v863_v18 }
 0x3e6   :  { %v866_v36 = vmul.f32 0.125, %v865_v21 }
 0x3e8   :  { %v867_v25 = vsub.f32 %v857_v29, %v866_v36 }
 0x3ea   :  { %v868_v4 = vmul.f32 %v867_v25, %v867_v25 }
 0x3ec   :  { %v869_v37 = vsel %vm858_vm2, %v868_v4, 0.0 }
 0x3ed   :  { %v870_v22 = vrot.slane %v869_v37, 4 }
 0x3ef   :  { %v871_v38 = vadd.f32 %v870_v22, %v869_v37 }
 0x3f1   :  { %v872_v40 = vrot.slane %v871_v38, 2 }
 0x3f3   :  { %v873_v41 = vadd.f32 %v872_v40, %v871_v38 }
 0x3f5   :  { %v874_v43 = vrot.slane %v873_v41, 1 }
 0x3f7   :  { %v875_v45 = vadd.f32 %v874_v43, %v873_v41 }
 0x3f9   :  { %v876_v39 = vmul.f32 0.125, %v875_v45 }
 0x3fb   :  { %v877_v44 = vadd.f32 1e-05, %v876_v39 }
 0x3fd   :  { %1065 = vrsqrt.f32 %v877_v44  ;;  %vm884_vm4 = vweird.f32 %v877_v44 }
 0x403   :  { %v1066_v51 = vpop.eup %1065 }
 0x404   :  { %v879_v52 = vmul.f32 %v1066_v51, %v877_v44  ;;  %vm885_vm3 = vweird.f32 %v1066_v51 }
 0x405   :  { %vm886_vm5 = vmor %vm884_vm4, %vm885_vm3 }
 0x406   :  { %v880_v35 = vmul.f32 %v1066_v51, %v879_v52 }
 0x408   :  { %v881_v53 = vmul.f32 0.5, %v880_v35 }
 0x40a   :  { %v882_v54 = vsub.f32 1.5, %v881_v53 }
 0x40c   :  { %v883_v55 = vmul.f32 %v1066_v51, %v882_v54 }
 0x40e   :  { %v887_v57 = vsel %vm886_vm5, %v1066_v51, %v883_v55 }
 0x40f   :  { %v889_v34 = vmul.f32 %v888_v56, %v887_v57 }
 0x411   :  { %v890_v58 = vperm.slane %v889_v34, 0 }
 0x413   :  { %v891_v60 = vmul.f32 %v890_v58, %v867_v25 }
 0x415   :  { %v896_v61 = vadd.f32 %v1059_v59, %v891_v60 }
 0x417   :  { %v906_v62 = vrot.slane %v896_v61, 6  ;;  %v902_v63 = vrot.slane %v896_v61, 4  ;;  %v898_v0 = vrot.slane %v896_v61, 2 }
 0x419   :  { %907 = vrot.lane.b32.xlu1 %v906_v62, %s1104_s27  ;;  %903 = vrot.lane.b32.xlu0 %v902_v63, %s1103_s0 }
 0x41a   :  { %899 = vrot.lane.b32.xlu2 %v898_v0, %s1105_s28 }
 0x474   :  { %v900_v3 = vpop.permute.xlu2 %899 }
 0x475   :  { %v910_v5 = vsel %vm858_vm2, %v896_v61, %v900_v3 }
 0x48b   :  { %v908_v6 = vpop.permute.xlu1 %907  ;;  %v904_v7 = vpop.permute.xlu0 %903 }
 0x48c   :  { %v911_v8 = vsel %vm710_vm11, %v910_v5, %v904_v7 }
 0x48d   :  { %v913_v9 = vsel %vm912_vm7, %v911_v8, %v908_v6 }
 0x48e   :  { %1027 = vmatmul.msk.f32.vlgmr.msrb.gmra.mxu1 %vm786_vm15, %v913_v9 }
 0x50b   :  { %v948_v10 = vpop.f32.mrf.mxu1 }
 0x50c   :  { %v949_v12 = vadd.f32 %v1060_v16, %v948_v10 }
 0x50e   :  { %v951_v13 = vsel %vm612_vm6, %v949_v12, -inf }
 0x50f   :  { %952 = vmax.xlane.f32.xlu2 %v951_v13 }
 0x582   :  { %v953_v14 = vpop.xlane.xlu2 %952 }
 0x583   :  { %v954_v15 = vsub.f32 %v949_v12, %v953_v14 }
 0x585   :  { %v955_v24 = vmul.f32 1.442695, %v954_v15 }
 0x587   :  { %1067 = vpow2.f32 %v955_v24 }
 0x58d   :  { %v1068_v33 = vpop.eup %1067 }
 0x58e   :  { %v957_v42 = vsel %vm612_vm6, %v1068_v33, 0.0 }
 0x58f   :  { %958 = vadd.xlane.f32.xlu0 %v957_v42 }
 0x602   :  { %v959_v23 = vpop.xlane.xlu0 %958 }
 0x603   :  { %1069 = vrcp.f32 %v959_v23  ;;  %v971_v30 = vand.u32 2147483648, %v959_v23  ;;  %v969_v27 = vand.u32 2147483647, %v959_v23  ;;  %vm965_vm9 = vweird.f32 %v959_v23 }
 0x605   :  { %v972_v18 = vor.u32 1.1754944e-38, %v971_v30  ;;  %vm970_vm6 = vcmp.eq.f32.partialorder %v969_v27, 8.507059e+37 }
 0x609   :  { %v1070_v28 = vpop.eup %1069 }
 0x60a   :  { %v961_v11 = vmul.f32 %v1070_v28, %v959_v23  ;;  %vm966_vm8 = vweird.f32 %v1070_v28 }
 0x60b   :  { %vm967_vm10 = vmor %vm965_vm9, %vm966_vm8 }
 0x60c   :  { %v962_v29 = vsub.f32 1.0, %v961_v11 }
 0x60e   :  { %v963_v31 = vmul.f32 %v1070_v28, %v962_v29 }
 0x610   :  { %v964_v32 = vadd.f32 %v1070_v28, %v963_v31 }
 0x612   :  { %v968_v19 = vsel %vm967_vm10, %v1070_v28, %v964_v32 }
 0x613   :  { %v973_v21 = vsel %vm970_vm6, %v972_v18, %v968_v19 }
 0x614   :  { %v974_v36 = vmul.f32 %v1068_v33, %v973_v21 }
 0x616   :  { %975 = vst [vmem:[#allocation2] sm:$0x3] %v974_v36 }
 0x617   :  { %986 = dma.vmem_to_hbm [thread:$0]  %s982_s14, 32, %s984_s19, [#allocation3]  }
 0x618   :  { %1095 = dma.done.wait [#allocation3], 32  }
 0x619   :  { %1096 = vsyncadd [#allocation3], 4294967264 }
 0x61a   :  { %991 = vsyncpa [#allocation3], 1 }

</bundles_post_ra>
